<compile_context>
chip_gen: v7x
topology: tpu7x:2x2x1
jax: 0.10.0
libtpu: 0.0.40
codegen_flags: <defaults>
</compile_context>

<pallas_src>
import jax
import jax.numpy as jnp
from jax import lax
from jax.experimental import pallas as pl
from jax.experimental.pallas import tpu as pltpu


def _einsum_bhid_bhjd_kernel(a_ref, b_ref, o_ref):
    # a_ref: (Gt, TI, D), b_ref: (Gt, Jp, D), o_ref: (Gt, TI, Jp) VMEM blocks.
    # Batched contraction over the last dim of both operands; no transpose is
    # materialized — the MXU is fed the native [Jp, D] tile.
    o_ref[...] = lax.dot_general(
        a_ref[...],
        b_ref[...],
        dimension_numbers=(((2,), (2,)), ((0,), (0,))),
        preferred_element_type=jnp.float32,
    ).astype(o_ref.dtype)


def einsum_bhid_bhjd(a, b):
    """Pallas implementation of jnp.einsum('bhid,bhjd->bhij', a, b)."""
    B, H, I, D = a.shape
    Bb, Hb, J, Db = b.shape
    assert (B, H, D) == (Bb, Hb, Db), "operand shapes incompatible with bhid,bhjd->bhij"

    out_dtype = jnp.result_type(a.dtype, b.dtype)
    a = a.astype(out_dtype)
    b = b.astype(out_dtype)
    itemsize = jnp.dtype(out_dtype).itemsize

    G = B * H
    a_f = a.reshape(G, I, D)
    b_f = b.reshape(G, J, D)

    # --- lane-dense output: pad J up to a multiple of 128 when it is large ---
    # (padding tiny J would only inflate writeback bytes; full-extent blocks of
    #  small J are still legal block shapes).
    if J >= 128 and J % 128 != 0:
        J_p = ((J + 127) // 128) * 128
        b_f = jnp.pad(b_f, ((0, 0), (0, J_p - J), (0, 0)))
    else:
        J_p = J

    # Double-buffered working-set budget.  20 MiB keeps us under the 32 MiB
    # scoped-VMEM default on every generation (and well inside v7x's 64 MiB
    # physical VMEM) while still giving near-roofline tile sizes.
    BUDGET = 20 * 1024 * 1024
    per_group = (I * D + J_p * D + I * J_p) * itemsize  # one (b,h) group's blocks

    if 2 * per_group <= BUDGET:
        # Batch several heads per grid step; no I tiling needed.
        divisors = [d for d in range(1, G + 1) if G % d == 0]
        fitting = [d for d in divisors if 2 * d * per_group <= BUDGET]
        # Prefer a grid extent >= 2 so both v7x TensorCores get work.
        pref = [d for d in fitting if G // d >= 2]
        Gt = max(pref) if pref else max(fitting)
        TI = I
        I_p = I
        a_p = a_f
    else:
        # Large SEQ: one group per step, tile I so the double-buffered
        # (TI,D)+(Jp,D)+(TI,Jp) working set stays inside the budget.
        Gt = 1
        fixed = J_p * D * itemsize
        per_row = (D + J_p) * itemsize
        avail = BUDGET // 2 - fixed
        TI = max(8, (avail // per_row // 8) * 8) if avail > 0 else 8
        TI = min(TI, max(8, ((I + 7) // 8) * 8))
        I_p = pl.cdiv(I, TI) * TI
        a_p = jnp.pad(a_f, ((0, 0), (0, I_p - I), (0, 0))) if I_p != I else a_f

    grid = (G // Gt, I_p // TI)

    out = pl.pallas_call(
        _einsum_bhid_bhjd_kernel,
        out_shape=jax.ShapeDtypeStruct((G, I_p, J_p), out_dtype),
        grid_spec=pltpu.PrefetchScalarGridSpec(
            num_scalar_prefetch=0,
            grid=grid,
            in_specs=[
                pl.BlockSpec((Gt, TI, D), lambda g, i: (g, i, 0)),
                # Same B block revisited across the (inner) I axis -> stays resident.
                pl.BlockSpec((Gt, J_p, D), lambda g, i: (g, 0, 0)),
            ],
            out_specs=pl.BlockSpec((Gt, TI, J_p), lambda g, i: (g, i, 0)),
        ),
        compiler_params=pltpu.CompilerParams(
            dimension_semantics=("parallel", "parallel"),
        ),
    )(a_p, b_f)

    # Strip padding (no-op when nothing was padded) and restore (B, H, I, J).
    out = out[:, :I, :J]
    return out.reshape(B, H, I, J)


class Einsum:
    """JAX/Pallas counterpart of the towhee `Einsum` relprop module (forward only)."""

    def __init__(self, equation):
        self.equation = equation
        # Only the equation used by the towhee relprop models is lowered to a
        # hand-written Pallas kernel here.
        assert equation == "bhid,bhjd->bhij", "only 'bhid,bhjd->bhij' is implemented"

    def __call__(self, *operands):
        a, b = operands
        return einsum_bhid_bhjd(a, b)


if __name__ == "__main__":
    key = jax.random.PRNGKey(0)
    k1, k2, k3, k4 = jax.random.split(key, 4)

    mod = Einsum("bhid,bhjd->bhij")

    # Small canonical test (matches the module's attention-score usage).
    B, H, SEQ, D = 2, 4, 8, 32
    q = jax.random.normal(k1, (B, H, SEQ, D), dtype=jnp.float32)
    k = jax.random.normal(k2, (B, H, SEQ, D), dtype=jnp.float32)
    out = mod(q, k)
    jax.block_until_ready(out)
    ref = jnp.einsum("bhid,bhjd->bhij", q, k)
    assert out.shape == ref.shape and out.dtype == ref.dtype
    assert jnp.allclose(out, ref, atol=1e-5, rtol=1e-5)

    # Second test exercising the unaligned-J (ViT-relprop, SEQ=197) padding path.
    B2, H2, SEQ2, D2 = 1, 2, 197, 64
    q2 = jax.random.normal(k3, (B2, H2, SEQ2, D2), dtype=jnp.float32)
    k2_ = jax.random.normal(k4, (B2, H2, SEQ2, D2), dtype=jnp.float32)
    out2 = mod(q2, k2_)
    jax.block_until_ready(out2)
    ref2 = jnp.einsum("bhid,bhjd->bhij", q2, k2_)
    assert out2.shape == ref2.shape and out2.dtype == ref2.dtype
    assert jnp.allclose(out2, ref2, atol=1e-4, rtol=1e-4)

    print("KERNEL_OK")
</pallas_src>

<mosaic_0001>
module attributes {stable_mosaic.version = 11 : i64} {
  func.func @_einsum_bhid_bhjd_kernel(%arg0: i32, %arg1: i32, %arg2: memref<4x8x32xf32, #tpu.memory_space<vmem>>, %arg3: memref<4x8x32xf32, #tpu.memory_space<vmem>>, %arg4: memref<4x8x8xf32, #tpu.memory_space<vmem>>) attributes {dimension_semantics = [#tpu.dimension_semantics<parallel>, #tpu.dimension_semantics<parallel>], iteration_bounds = array<i64: 2, 1>, scalar_prefetch = 0 : i64, scratch_operands = 0 : i64, tpu.core_type = #tpu.core_type<tc>, window_params = [{transform_indices = @transform_0, window_bounds = array<i64: 4, 8, 32>}, {transform_indices = @transform_1, window_bounds = array<i64: 4, 8, 32>}, {transform_indices = @transform_2, window_bounds = array<i64: 4, 8, 8>}]} {
    %c0 = arith.constant 0 : index
    %c0_0 = arith.constant 0 : index
    %c0_1 = arith.constant 0 : index
    %0 = vector.load %arg2[%c0, %c0_0, %c0_1] : memref<4x8x32xf32, #tpu.memory_space<vmem>>, vector<4x8x32xf32>
    %c0_2 = arith.constant 0 : index
    %c0_3 = arith.constant 0 : index
    %c0_4 = arith.constant 0 : index
    %1 = vector.load %arg3[%c0_2, %c0_3, %c0_4] : memref<4x8x32xf32, #tpu.memory_space<vmem>>, vector<4x8x32xf32>
    %cst = arith.constant dense<0.000000e+00> : vector<4x8x8xf32>
    %2 = tpu.matmul %0, %1, %cst {dimension_numbers = #tpu.dot_dimension_numbers<[2], [2], [1], [1], [0, 0, 0, 1, 1, 1], [0], [0]>} : vector<4x8x32xf32>, vector<4x8x32xf32>, vector<4x8x8xf32> -> vector<4x8x8xf32>
    %c0_5 = arith.constant 0 : index
    %c0_6 = arith.constant 0 : index
    %c0_7 = arith.constant 0 : index
    %3 = vector.load %arg4[%c0_5, %c0_6, %c0_7] : memref<4x8x8xf32, #tpu.memory_space<vmem>>, vector<4x8x8xf32>
    tpu.vector_store %arg4[%c0_5, %c0_6, %c0_7], %2 {strides = array<i32>} : memref<4x8x8xf32, #tpu.memory_space<vmem>>, vector<4x8x8xf32>,
    return
  }
  func.func @transform_0(%arg0: i32, %arg1: i32) -> (i32, i32, i32) {
    %c0_i32 = arith.constant 0 : i32
    %c0_i32_0 = arith.constant 0 : i32
    return %arg0, %arg1, %c0_i32 : i32, i32, i32
  }
  func.func @transform_1(%arg0: i32, %arg1: i32) -> (i32, i32, i32) {
    %c0_i32 = arith.constant 0 : i32
    %c0_i32_0 = arith.constant 0 : i32
    %c0_i32_1 = arith.constant 0 : i32
    return %arg0, %c0_i32, %c0_i32_0 : i32, i32, i32
  }
  func.func @transform_2(%arg0: i32, %arg1: i32) -> (i32, i32, i32) {
    %c0_i32 = arith.constant 0 : i32
    %c0_i32_0 = arith.constant 0 : i32
    return %arg0, %arg1, %c0_i32 : i32, i32, i32
  }
}

</mosaic_0001>

<bundles_post_ra>
// kernel: tpu_custom_call.1
= control target key start
LH: loop header
LB: loop body
LE: loop exit
PB: predicated region body
PF: predicated region fallthrough
CT: control target
= control target key end

     0   :  { %7 = vsyncpa [#allocation3], 0  ;;  %s1219_s0 = inlined_call_operand.hbm [shape: f32[8,8,32], index: 0, kind: input, shape index: {}]   ;;  %s1220_s1 = inlined_call_operand.hbm [shape: f32[8,8,32], index: 1, kind: input, shape index: {}]   ;;  %s1221_s2 = inlined_call_operand.hbm [shape: f32[8,8,8], index: 2, kind: output, shape index: {}]  }
   0x1   :  { %9 = vsyncpa [#allocation3 + $0x1], 0 }
   0x2   :  { %10 = vsyncpa [#allocation6], 0 }
   0x3   :  { %12 = vsyncpa [#allocation6 + $0x1], 0 }
   0x4   :  { %13 = vsyncpa [#allocation4], 0 }
   0x5   :  { %15 = vsyncpa [#allocation4 + $0x1], 0  ;;  %s966_s9 = smov 0   ;;  %s968_s10 = smov 0  }
   0x6   :  { %s970_s11 = smov 0   ;;  %s972_s12 = smov 0  }
   0x7   :  { %s974_s13 = smov 0   ;;  %s976_s14 = smov 0  }
   0x8 LB: > { %s663_s15 = sadd.s32 4294967295, %s940_s14   ;;  %s664_s16 = sadd.s32 4294967294, %s940_s14   ;;  %s940_s14 = sphi %s976_s14, %s21_s14   ;;  %s936_s13 = sphi %s974_s13, %s1239_s13   ;;  %s932_s12 = sphi %s972_s12, %s1238_s12   ;;  %s928_s11 = sphi %s970_s11, %s1237_s11   ;;  %s924_s10 = sphi %s968_s10, %s1236_s10   ;;  %s920_s9 = sphi %s966_s9, %s1235_s9  }
   0x9   : > { %s33_s17 = sadd.s32 1, %s936_s13  ;;  %s42_s18 = sadd.s32 1, %s928_s11 }
   0xa   : > { %p35_p0 = scmp.ge.s32.totalorder %s33_s17, 2  ;;  %p49_p1 = scmp.ne.s32.totalorder %s928_s11, %s924_s10 }
   0xb   : > { %p50_p2 = scmp.eq.s32.totalorder %s940_s14, 0  ;;  %p55_p3 = scmp.ne.s32.totalorder %s924_s10, %s920_s9 }
   0xc   : > { %s1241_s17 = smov (%p35_p0, %s33_s17), 0  ;;  %p56_p5 = scmp.eq.s32.totalorder %s663_s15, 0 }
   0xd   : > { %p1007_p4 = por %p50_p2, %p49_p1  ;;  %s37_s20 = ssub.s32 %s936_s13, %s1241_s17 }
   0xe   : > { %p107_p6 = scmp.eq.s32.totalorder %s663_s15, 1  ;;  %p40_p7 = scmp.eq.s32.totalorder %s37_s20, 0 }
   0xf   : > { %p1013_p8 = por %p56_p5, %p55_p3  ;;  %p113_p10 = scmp.eq.s32.totalorder %s664_s16, 1 }
  0x10   : > { %p1017_p9 = por %p107_p6, %p49_p1  ;;  %p738_p13 = scmp.lt.s32.totalorder %s940_s14, 2 }
  0x11   : > { %s1225_s21 = scalar_select %p1013_p8, 1, 0 }
  0x12   : > { %s1226_s22 = scalar_select %p1017_p9, 1, 0 }
  0x13   : > { %s1022_s23 = scalar_select %p40_p7, %s928_s11, %s42_s18  }
  0x14   : > { %p1024_p11 = por %p113_p10, %p55_p3  ;;  %s1031_s25 = sand.u32 1, %s928_s11  }
  0x15   : > { %s667_s26 = sshll.u32 %s1031_s25, 5  ;;  %s690_s27 = sshll.u32 %s936_s13, 9 }
  0x16   : > { %s1227_s24 = scalar_select %p1024_p11, 1, 0 }
  0x17   : > { %s1040_s30 = scalar_lea.hbm %s1219_s0, %s690_s27  ;;  %s137_s3 = scalar_lea.vmem [#allocation2], %s667_s26 }
  0x18   : > { %s145_s4 = sshll.u32 %s137_s3, 4  ;;  %p1048_p0 = pnand %p738_p13, %p1007_p4  ;;  %s1044_s4 = int_to_ptr.vmem [resolvable:$true] %s145_s4 }
  0x19   : > { %s134_s6 = scalar_lea.sflag [#allocation3], %s1031_s25  ;;  %s794_s7 = scalar_lea.hbm %s1040_s30, 512 }
  0x1a   : > { %p795_p2 = scmp.ne.s32.totalorder %s1040_s30, %s794_s7  ;;  %p796_p3 = pneg %p1048_p0 }
  0x1b   : > { %s799_s16 = scalar_lea.hbm %s1219_s0, 1024  ;;  %p800_p4 = scmp.lt.u32.totalorder %s1040_s30, %s1219_s0 }
  0x1c   : > { %p797_p5 = pnand %p796_p3, %p795_p2  ;;  %p801_p7 = scmp.lt.u32.totalorder %s799_s16, %s794_s7 }
  0x1d   : > { %p803_p13 = scmp.lt.u32.totalorder %s794_s7, %s1040_s30 }
  0x1e   : > { %p798_p6 = pneg %p797_p5  ;;  %p802_p10 = por %p801_p7, %p800_p4 }
  0x20   : > { %p804_p12 = por %p803_p13, %p802_p10 }
  0x22   : > { %p805_p1 = pnand %p804_p12, %p798_p6 }
  0x24   : > { %808 = shalt.err (!%p805_p1)
}
  0x25   : > { %s809_s20 = scalar_lea.vmem %s1044_s4, 512  ;;  %s942_s28 = smov [#allocation2]  }
  0x26   : > { %p810_p2 = scmp.ne.s32.totalorder %s1044_s4, %s809_s20  ;;  %s814_s29 = sshll.u32 %s942_s28, 4  ;;  %s815_s29 = int_to_ptr.vmem [resolvable:$false] %s814_s29 }
  0x27   : > { %s816_s3 = scalar_lea.vmem %s815_s29, 1024  ;;  %p817_p9 = scmp.lt.s32.totalorder %s1044_s4, %s815_s29 }
  0x28   : > { %p812_p5 = pnand %p810_p2, %p796_p3  ;;  %p818_p4 = scmp.lt.s32.totalorder %s816_s3, %s809_s20 }
  0x2a   : > { %p813_p11 = pneg %p812_p5  ;;  %p819_p7 = por %p818_p4, %p817_p9 }
  0x2c   : > { %p820_p10 = pnand %p819_p7, %p813_p11 }
  0x2e   : > { %823 = shalt.err (!%p820_p10)
}
  0x2f   : > { %s943_s7 = smov 128   ;;  %s944_s8 = smov 8  }
  0x30   : > { %730 = dma.hbm_to_vmem [thread:$0]  (!%p1048_p0), %s1040_s30, 512, %s1044_s4, %s134_s6, %s943_s7, %s943_s7, %s944_s8  }
  0x31   : > { %p174_p9 = scmp.lt.s32.totalorder %s940_s14, 3  ;;  %s1090_s18 = scalar_lea.hbm %s1220_s1, %s690_s27 }
  0x32   : > { %p1229_p11 = scmp.ge.s32.totalorder %s940_s14, 1  ;;  %s159_s20 = scalar_lea.vmem [#allocation5], %s667_s26 }
  0x33   : > { %s166_s28 = sshll.u32 %s159_s20, 4  ;;  %s156_s30 = scalar_lea.sflag [#allocation6], %s1031_s25  ;;  %s1100_s28 = int_to_ptr.vmem [resolvable:$true] %s166_s28 }
  0x34   : > { %p1094_p12 = pnand %p1229_p11, %p174_p9  ;;  %s824_s4 = scalar_lea.hbm %s1090_s18, 512 }
  0x35   : > { %p825_p1 = scmp.ne.s32.totalorder %s1090_s18, %s824_s4  ;;  %s829_s29 = scalar_lea.hbm %s1220_s1, 1024 }
  0x36   : > { %p830_p2 = scmp.lt.u32.totalorder %s1090_s18, %s1220_s1  ;;  %p831_p5 = scmp.lt.u32.totalorder %s829_s29, %s824_s4 }
  0x37   : > { %p827_p6 = pnand %p825_p1, %p796_p3  ;;  %p833_p7 = scmp.lt.u32.totalorder %s824_s4, %s1090_s18 }
  0x38   : > { %p832_p4 = por %p831_p5, %p830_p2 }
  0x39   : > { %p828_p13 = pneg %p827_p6 }
  0x3a   : > { %p834_p10 = por %p833_p7, %p832_p4 }
  0x3c   : > { %p835_p9 = pnand %p834_p10, %p828_p13 }
  0x3e   : > { %838 = shalt.err (!%p835_p9)
}
  0x3f   : > { %s839_s26 = scalar_lea.vmem %s1100_s28, 512  ;;  %s945_s16 = smov [#allocation5]  }
  0x40   : > { %p840_p11 = scmp.ne.s32.totalorder %s1100_s28, %s839_s26  ;;  %s844_s20 = sshll.u32 %s945_s16, 4  ;;  %s845_s20 = int_to_ptr.vmem [resolvable:$false] %s844_s20 }
  0x41   : > { %s846_s27 = scalar_lea.vmem %s845_s20, 1024  ;;  %p847_p8 = scmp.lt.s32.totalorder %s1100_s28, %s845_s20 }
  0x42   : > { %p842_p1 = pnand %p840_p11, %p796_p3  ;;  %p848_p2 = scmp.lt.s32.totalorder %s846_s27, %s839_s26 }
  0x44   : > { %p843_p6 = pneg %p842_p1  ;;  %p849_p5 = por %p848_p2, %p847_p8 }
  0x46   : > { %p850_p4 = pnand %p849_p5, %p843_p6 }
  0x48   : > { %853 = shalt.err (!%p850_p4)
}
  0x49   : > { %733 = dma.hbm_to_vmem [thread:$0]  (!%p1048_p0), %s1090_s18, 512, %s1100_s28, %s156_s30, %s943_s7, %s943_s7, %s944_s8  }
  0x4a   : > { %178 = sbr.rel (%p1094_p12) target bundleno = 321 (0x141), region = 28  ;;  %s1134_s4 = sand.u32 (!%p1094_p12), 1, %s924_s10  }
  0x4b   : > { %s1137_s6 = sshll.u32 (!%p1094_p12), %s1134_s4, 5  ;;  %s181_s5 = scalar_lea.sflag (!%p1094_p12), [#allocation3], %s1134_s4 }
  0x4c   : > { %s184_s29 = scalar_lea.vmem (!%p1094_p12), [#allocation2], %s1137_s6  ;;  %p1231_p8 = scmp.ne.s32.totalorder (!%p1094_p12), %s1225_s21, 0 }
  0x51   : > { %907 = dma.done.wait (%p1231_p8), %s181_s5, 512  }
  0x52   : > { %909 = vsyncadd (%p1231_p8), %s181_s5, 4294966784  ;;  %s190_s25 = scalar_lea.sflag [#allocation6], %s1134_s4  ;;  %s193_s7 = scalar_lea.vmem [#allocation5], %s1137_s6 }
  0x53   : > { %911 = dma.done.wait (%p1231_p8), %s190_s25, 512  }
  0x54   : > { %913 = vsyncadd (%p1231_p8), %s190_s25, 4294966784  ;;  %v946_v0 = vmov 0.0   ;;  %vm947_vm0 = vmmov 0   ;;  %vm230_vm1 = vcmask 261120   ;;  %v226_v1 = vld [vmem:[%s193_s7] sm:$0xff]  ;;  %v227_v2 = vld [vmem:[%s193_s7 + $0x8] sm:$0xff] }
  0x55   : > { %701 = vmatprep.subr.mxu0 %v946_v0  ;;  %706 = vmatprep.subr.mxu1 %v946_v0  ;;  %v222_v3 = vld [vmem:[%s184_s29] sm:$0xff]  ;;  %v223_v4 = vld [vmem:[%s184_s29 + $0x8] sm:$0xff]  ;;  %v228_v5 = vld [vmem:[%s193_s7 + $0x10] sm:$0xff]  ;;  %vm535_vm2 = vcmask 64512   ;;  %s218_s21 = scalar_lea.vmem [#allocation7], %s1137_s6  ;;  %s692_s18 = sshll.u32 %s932_s12, 9 }
  0x56   : > { %703 = vmatprep.mubr.msk.f32.mxu0 %vm947_vm0, %v946_v0  ;;  %708 = vmatprep.mubr.msk.f32.mxu1 %vm947_vm0, %v946_v0  ;;  %v229_v6 = vld [vmem:[%s193_s7 + $0x18] sm:$0xff]  ;;  %v224_v7 = vld [vmem:[%s184_s29 + $0x10] sm:$0xff]  ;;  %s555_s8 = sshll.u32 %s218_s21, 4  ;;  %s1170_s30 = scalar_lea.hbm %s1221_s2, %s692_s18  ;;  %s1165_s8 = int_to_ptr.vmem [resolvable:$true] %s555_s8 }
  0x57   : > { %702 = vmatpush3.xpose.msk.msra.mxu0 %vm230_vm1, %v226_v1  ;;  %707 = vmatpush3.xpose.msk.msra.mxu1 %vm230_vm1, %v227_v2  ;;  %v225_v8 = vld [vmem:[%s184_s29 + $0x18] sm:$0xff]  ;;  %s541_s12 = scalar_lea.sflag [#allocation4], %s1134_s4  ;;  %s854_s3 = scalar_lea.vmem %s1165_s8, 512 }
  0x58   : > { %711 = vmatprep.subr.mxu0 %v946_v0  ;;  %716 = vmatprep.subr.mxu1 %v946_v0  ;;  %p855_p0 = scmp.ne.s32.totalorder %s1165_s8, %s854_s3  ;;  %p1232_p3 = scmp.ne.s32.totalorder %s1226_s22, 0 }
  0x59   : > { %s948_s15 = smov [#allocation7]  }
  0x5a   : > { %704 = vmatmul.mubr.msk.f32.vlgmr.msra.gmra.mrb[0].mxu0 %vm230_vm1, %v222_v3  ;;  %709 = vmatmul.mubr.msk.f32.vlgmr.msra.gmra.mrb[0].mxu1 %vm230_vm1, %v223_v4  ;;  %p856_p12 = pnand %p855_p0, %p1232_p3  ;;  %s858_s26 = sshll.u32 %s948_s15, 4  ;;  %s859_s26 = int_to_ptr.vmem [resolvable:$false] %s858_s26 }
  0x5b   : > { %712 = vmatpush3.xpose.msk.msra.mxu0 %vm230_vm1, %v228_v5  ;;  %717 = vmatpush3.xpose.msk.msra.mxu1 %vm230_vm1, %v229_v6  ;;  %s860_s16 = scalar_lea.vmem %s859_s26, 1024  ;;  %p861_p7 = scmp.lt.s32.totalorder %s1165_s8, %s859_s26 }
  0x5c   : > { %713 = vmatprep.mubr.msk.f32.mxu0 %vm947_vm0, %v946_v0  ;;  %718 = vmatprep.mubr.msk.f32.mxu1 %vm947_vm0, %v946_v0  ;;  %p857_p13 = pneg %p856_p12  ;;  %p862_p10 = scmp.lt.s32.totalorder %s860_s16, %s854_s3 }
  0x5e   : > { %714 = vmatmul.mubr.msk.f32.vlgmr.msra.gmra.mrb[2].mxu0 %vm230_vm1, %v224_v7  ;;  %719 = vmatmul.mubr.msk.f32.vlgmr.msra.gmra.mrb[2].mxu1 %vm230_vm1, %v225_v8  ;;  %p863_p9 = por %p862_p10, %p861_p7 }
  0x60   : > { %p864_p11 = pnand %p863_p9, %p857_p13 }
 0x12d   : > { %v303_v9 = vpop.f32.mrb[0].mxu0  ;;  %v379_v10 = vpop.f32.mrb[0].mxu1 }
 0x12e   : > { %536 = vst.msk [vmem:[%s218_s21] sm:$0xff] %vm535_vm2, %v303_v9  ;;  %537 = vst.msk [vmem:[%s218_s21 + $0x8] sm:$0xff] %vm535_vm2, %v379_v10  ;;  %v705_v11 = vpop.f32.mrb[1].mxu0  ;;  %v710_v12 = vpop.f32.mrb[1].mxu1 }
 0x131   : > { %v455_v13 = vpop.f32.mrb[2].mxu0  ;;  %v531_v14 = vpop.f32.mrb[2].mxu1 }
 0x132   : > { %538 = vst.msk [vmem:[%s218_s21 + $0x10] sm:$0xff] %vm535_vm2, %v455_v13  ;;  %539 = vst.msk [vmem:[%s218_s21 + $0x18] sm:$0xff] %vm535_vm2, %v531_v14  ;;  %v715_v15 = vpop.f32.mrb[3].mxu0  ;;  %v720_v16 = vpop.f32.mrb[3].mxu1 }
 0x133   : > { %867 = shalt.err (!%p864_p11)
}
 0x134   : > { %s868_s20 = scalar_lea.hbm %s1170_s30, 512  ;;  %s872_s5 = scalar_lea.hbm %s1221_s2, 1024 }
 0x135   : > { %p869_p1 = scmp.ne.s32.totalorder %s1170_s30, %s868_s20  ;;  %p873_p5 = scmp.lt.u32.totalorder %s1170_s30, %s1221_s2 }
 0x136   : > { %p874_p4 = scmp.lt.u32.totalorder %s872_s5, %s868_s20  ;;  %p876_p0 = scmp.lt.u32.totalorder %s868_s20, %s1170_s30 }
 0x137   : > { %p870_p6 = pnand %p869_p1, %p1232_p3 }
 0x138   : > { %p875_p8 = por %p874_p4, %p873_p5 }
 0x139   : > { %p871_p2 = pneg %p870_p6 }
 0x13a   : > { %p877_p12 = por %p876_p0, %p875_p8 }
 0x13c   : > { %p878_p13 = pnand %p877_p12, %p871_p2 }
 0x13e   : > { %881 = shalt.err (!%p878_p13)
}
 0x13f   : > { %s949_s7 = smov 128   ;;  %s950_s21 = smov 8  }
 0x140   : > { %725 = dma.vmem_to_hbm [thread:$0]  (%p1232_p3), %s1165_s8, 512, %s1170_s30, %s541_s12, %s949_s7, %s949_s7, %s950_s21  }
 0x141 PF: > { %s570_s18 = sand.u32 1, %s920_s9   ;;  %p1233_p7 = scmp.ne.s32.totalorder %s1227_s24, 0 }
 0x142   : > { %p1234_p10 = scmp.ge.s32.totalorder %s940_s14, 2  ;;  %s571_s19 = scalar_lea.sflag [#allocation4], %s570_s18 }
 0x144   : > { %p735_p9 = pnand %p1234_p10, %p1233_p7 }
 0x146   : > { %915 = dma.done.wait (!%p735_p9), %s571_s19, 512  }
 0x147   : > { %917 = vsyncadd (!%p735_p9), %s571_s19, 4294966784  ;;  %s21_s14 = sadd.s32 1, %s940_s14   ;;  %s1235_s9 = smov %s924_s10 }
 0x148   : > { %p18_p11 = scmp.ge.s32.totalorder %s21_s14, 4   ;;  %s1236_s10 = smov %s928_s11 }
 0x149   : > { %s1237_s11 = smov %s1022_s23  ;;  %s1238_s12 = smov %s936_s13 }
 0x14a   : > { %s1239_s13 = smov %s1241_s17  ;;  %20 = sbr.rel (!%p18_p11) target bundleno = 8 (0x8), region = 86 }
 0x151   :  { %576 = vsyncpa [#allocation3], 1 }
 0x152   :  { %578 = vsyncpa [#allocation3 + $0x1], 1 }
 0x153   :  { %579 = vsyncpa [#allocation6], 1 }
 0x154   :  { %581 = vsyncpa [#allocation6 + $0x1], 1 }
 0x155   :  { %582 = vsyncpa [#allocation4], 1 }
 0x156   :  { %584 = vsyncpa [#allocation4 + $0x1], 1 }

</bundles_post_ra>
